<compile_context>
chip_gen: v5e
topology: v5e:2x2
jax: 0.10.0
libtpu: 0.0.40
codegen_flags: <defaults>
</compile_context>

<pallas_src>
import jax
import jax.numpy as jnp
from jax.experimental import pallas as pl
from jax.experimental.pallas import tpu as pltpu


def _round_up(x, m):
    return ((x + m - 1) // m) * m


# ---------------------------------------------------------------------------
# Kernels
# ---------------------------------------------------------------------------

def linear_kernel_f32out(x_ref, w_ref, b_ref, o_ref):
    """float32 output: accumulate directly into the resident output tile.

    x_ref: [tm, tk] bf16   w_ref: [tk, tn] bf16 (pre-transposed W)
    b_ref: [1,  tn] f32    o_ref: [tm, tn] f32 (block index constant over K)
    """
    k = pl.program_id(2)

    @pl.when(k == 0)
    def _():
        o_ref[...] = jnp.broadcast_to(b_ref[...], o_ref.shape)

    o_ref[...] += jnp.dot(x_ref[...], w_ref[...],
                          preferred_element_type=jnp.float32)


def linear_kernel_acc(x_ref, w_ref, b_ref, o_ref, acc_ref):
    """Narrow (bf16/fp8) output: f32 VMEM accumulator, downcast on last K step."""
    k = pl.program_id(2)

    @pl.when(k == 0)
    def _():
        acc_ref[...] = jnp.broadcast_to(b_ref[...], acc_ref.shape)

    acc_ref[...] += jnp.dot(x_ref[...], w_ref[...],
                            preferred_element_type=jnp.float32)

    @pl.when(k == pl.num_programs(2) - 1)
    def _():
        o_ref[...] = acc_ref[...].astype(o_ref.dtype)


# ---------------------------------------------------------------------------
# One-time parameter preparation (model init) -- NOT on the per-forward path.
# ---------------------------------------------------------------------------

def prepare_classifier_params(weight, bias, *, tn=1024, tk=2048,
                              compute_dtype=jnp.bfloat16):
    """weight: [C, H] (torch nn.Linear layout), bias: [C].

    Returns (w_t, b_p): W cast to bf16, padded, transposed to [Hp, Cp]
    (MXU-native [tk, tn] tiles) and bias padded to f32 [1, Cp]. Do this once.
    """
    C, H = weight.shape
    assert bias.shape == (C,)
    tn = min(tn, _round_up(C, 128))
    tk = min(tk, _round_up(H, 128))
    Cp, Hp = _round_up(C, tn), _round_up(H, tk)
    w_t = jnp.pad(weight.astype(compute_dtype).T, ((0, Hp - H), (0, Cp - C)))
    b_p = jnp.pad(bias.astype(jnp.float32), (0, Cp - C)).reshape(1, Cp)
    return w_t, b_p


# ---------------------------------------------------------------------------
# Forward
# ---------------------------------------------------------------------------

def classifier_forward(x, w_t, b_p, num_classes, *, tm=256, tn=1024, tk=2048,
                       compute_dtype=jnp.bfloat16):
    """x: [B, H] -> [B, num_classes].  w_t/b_p come from prepare_classifier_params."""
    B, H = x.shape
    Hp, Cp = w_t.shape
    assert b_p.shape == (1, Cp)
    out_dtype = x.dtype

    # Clamp tiles to the padded problem (tiny shapes -> single small tile).
    tm = min(tm, _round_up(B, 16))     # sublane dim of x / out
    tn = min(tn, Cp)                   # lane dim of out (lane-dense stores)
    tk = min(tk, Hp)                   # lane/contraction dim
    assert Cp % tn == 0 and Hp % tk == 0, "tile sizes must match prepared params"
    Bp = _round_up(B, tm)

    # Only x (small: B rows) is cast/padded per call; W/bias were prepped once.
    xp = x.astype(compute_dtype)
    if (Bp, Hp) != (B, H):
        xp = jnp.pad(xp, ((0, Bp - B), (0, Hp - H)))

    # NOTE(v7x): with a single M tile, cross-TensorCore balance comes from the
    # N grid axis -- for huge C prefer tn such that Cp // tn is even.
    grid = (Bp // tm, Cp // tn, Hp // tk)

    in_specs = [
        pl.BlockSpec((tm, tk), lambda i, j, k: (i, k)),   # x tile
        pl.BlockSpec((tk, tn), lambda i, j, k: (k, j)),   # W^T tile (MXU-native)
        pl.BlockSpec((1, tn), lambda i, j, k: (0, j)),    # bias tile
    ]
    out_spec = pl.BlockSpec((tm, tn), lambda i, j, k: (i, j))

    if out_dtype == jnp.float32:
        kernel = linear_kernel_f32out
        scratch_shapes = []
    else:
        kernel = linear_kernel_acc
        scratch_shapes = [pltpu.VMEM((tm, tn), jnp.float32)]

    out = pl.pallas_call(
        kernel,
        out_shape=jax.ShapeDtypeStruct((Bp, Cp), out_dtype),
        grid_spec=pltpu.PrefetchScalarGridSpec(
            num_scalar_prefetch=0,
            grid=grid,
            in_specs=in_specs,
            out_specs=out_spec,
            scratch_shapes=scratch_shapes,
        ),
        compiler_params=pltpu.CompilerParams(
            # M / N shard across TensorCores on v7x; K is the reduction axis.
            dimension_semantics=("parallel", "parallel", "arbitrary"),
            # ~13 MiB working set at default tiles; 48 MiB leaves headroom on
            # v7x's 64 MiB and is trivially fine on v5e/v6e's 128 MiB.
            vmem_limit_bytes=48 * 1024 * 1024,
        ),
    )(xp, w_t, b_p)

    if (Bp, Cp) != (B, num_classes):
        out = out[:B, :num_classes]
    return out


if __name__ == "__main__":
    # Small shapes consistent with the module: batch=8, hidden_dim=32, num_classes=16.
    # TODO(synk): at these toy shapes the call is pure launch/DMA overhead; real wins
    # appear at classifier-head scale (e.g. H=4096, C=128k) where W streams once.
    B, H, C = 8, 32, 16

    key = jax.random.PRNGKey(0)
    kx, kw, kb = jax.random.split(key, 3)

    x = jax.random.normal(kx, (B, H), dtype=jnp.float32)
    # Deterministic in-script parameter init (synthetic, not a checkpoint load).
    weight = jax.random.normal(kw, (C, H), dtype=jnp.float32) * (1.0 / jnp.sqrt(H))
    bias = jax.random.normal(kb, (C,), dtype=jnp.float32) * 0.01

    # One-time prep (cast + pad + transpose) -- off the per-forward path.
    w_t, b_p = prepare_classifier_params(weight, bias)

    out = jax.block_until_ready(classifier_forward(x, w_t, b_p, C))
    assert out.shape == (B, C)
    assert out.dtype == x.dtype

    # Reference with the same bf16 operand rounding (f32 accumulation),
    # matching the kernel's numerics.
    xr = x.astype(jnp.bfloat16).astype(jnp.float32)
    wr = weight.astype(jnp.bfloat16).astype(jnp.float32)
    ref_bf16 = xr @ wr.T + bias
    assert jnp.allclose(out, ref_bf16, atol=1e-4, rtol=1e-4)

    # Loose sanity check against full-f32 torch.nn.Linear semantics.
    ref_f32 = x @ weight.T + bias
    assert jnp.allclose(out, ref_f32, atol=1e-1)

    print("KERNEL_OK")
</pallas_src>

<mosaic_0001>
module attributes {stable_mosaic.version = 11 : i64} {
  func.func @linear_kernel_f32out(%arg0: i32, %arg1: i32, %arg2: i32, %arg3: memref<16x128xbf16, #tpu.memory_space<vmem>>, %arg4: memref<128x128xbf16, #tpu.memory_space<vmem>>, %arg5: memref<1x128xf32, #tpu.memory_space<vmem>>, %arg6: memref<16x128xf32, #tpu.memory_space<vmem>>) attributes {dimension_semantics = [#tpu.dimension_semantics<parallel>, #tpu.dimension_semantics<parallel>, #tpu.dimension_semantics<arbitrary>], iteration_bounds = array<i64: 1, 1, 1>, scalar_prefetch = 0 : i64, scratch_operands = 0 : i64, tpu.core_type = #tpu.core_type<tc>, window_params = [{transform_indices = @transform_0, window_bounds = array<i64: 16, 128>}, {transform_indices = @transform_1, window_bounds = array<i64: 128, 128>}, {transform_indices = @transform_2, window_bounds = array<i64: 1, 128>}, {transform_indices = @transform_3, window_bounds = array<i64: 16, 128>}]} {
    %c0_i32 = arith.constant 0 : i32
    %0 = arith.cmpi eq, %arg2, %c0_i32 : i32
    %1 = arith.extui %0 : i1 to i32
    %c0_i32_0 = arith.constant 0 : i32
    %2 = arith.cmpi ne, %1, %c0_i32_0 : i32
    scf.if %2 {
      %c0_8 = arith.constant 0 : index
      %c0_9 = arith.constant 0 : index
      %9 = vector.load %arg5[%c0_8, %c0_9] : memref<1x128xf32, #tpu.memory_space<vmem>>, vector<1x128xf32>
      %10 = vector.shape_cast %9 : vector<1x128xf32> to vector<1x128xf32>
      %11 = vector.broadcast %10 : vector<1x128xf32> to vector<16x128xf32>
      %c0_10 = arith.constant 0 : index
      %c0_11 = arith.constant 0 : index
      %12 = vector.load %arg6[%c0_10, %c0_11] : memref<16x128xf32, #tpu.memory_space<vmem>>, vector<16x128xf32>
      tpu.vector_store %arg6[%c0_10, %c0_11], %11 {strides = array<i32>} : memref<16x128xf32, #tpu.memory_space<vmem>>, vector<16x128xf32>,
    } else {
    }
    %c0 = arith.constant 0 : index
    %c0_1 = arith.constant 0 : index
    %3 = vector.load %arg6[%c0, %c0_1] : memref<16x128xf32, #tpu.memory_space<vmem>>, vector<16x128xf32>
    %c0_2 = arith.constant 0 : index
    %c0_3 = arith.constant 0 : index
    %4 = vector.load %arg3[%c0_2, %c0_3] : memref<16x128xbf16, #tpu.memory_space<vmem>>, vector<16x128xbf16>
    %c0_4 = arith.constant 0 : index
    %c0_5 = arith.constant 0 : index
    %5 = vector.load %arg4[%c0_4, %c0_5] : memref<128x128xbf16, #tpu.memory_space<vmem>>, vector<128x128xbf16>
    %cst = arith.constant dense<0.000000e+00> : vector<16x128xf32>
    %6 = tpu.matmul %4, %5, %cst {dimension_numbers = #tpu.dot_dimension_numbers<[1], [0], [0], [1], [0, 0, 1, 1], [], []>} : vector<16x128xbf16>, vector<128x128xbf16>, vector<16x128xf32> -> vector<16x128xf32>
    %7 = arith.addf %3, %6 : vector<16x128xf32>
    %c0_6 = arith.constant 0 : index
    %c0_7 = arith.constant 0 : index
    %8 = vector.load %arg6[%c0_6, %c0_7] : memref<16x128xf32, #tpu.memory_space<vmem>>, vector<16x128xf32>
    tpu.vector_store %arg6[%c0_6, %c0_7], %7 {strides = array<i32>} : memref<16x128xf32, #tpu.memory_space<vmem>>, vector<16x128xf32>,
    return
  }
  func.func @transform_0(%arg0: i32, %arg1: i32, %arg2: i32) -> (i32, i32) {
    %c0_i32 = arith.constant 0 : i32
    return %arg0, %arg2 : i32, i32
  }
  func.func @transform_1(%arg0: i32, %arg1: i32, %arg2: i32) -> (i32, i32) {
    %c0_i32 = arith.constant 0 : i32
    return %arg2, %arg1 : i32, i32
  }
  func.func @transform_2(%arg0: i32, %arg1: i32, %arg2: i32) -> (i32, i32) {
    %c0_i32 = arith.constant 0 : i32
    %c0_i32_0 = arith.constant 0 : i32
    return %c0_i32, %arg1 : i32, i32
  }
  func.func @transform_3(%arg0: i32, %arg1: i32, %arg2: i32) -> (i32, i32) {
    %c0_i32 = arith.constant 0 : i32
    return %arg0, %arg1 : i32, i32
  }
}

</mosaic_0001>

<bundles_post_ra>
// kernel: tpu_custom_call.1
= control target key start
LH: loop header
LB: loop body
LE: loop exit
PB: predicated region body
PF: predicated region fallthrough
CT: control target
= control target key end

     0   :  { %8 = vsyncpa [#allocation3], 0  ;;  %s339_s0 = inlined_call_operand.hbm [shape: bf16[16,128], index: 0, kind: input, shape index: {}]   ;;  %s340_s1 = inlined_call_operand.hbm [shape: bf16[128,128], index: 1, kind: input, shape index: {}]   ;;  %s341_s2 = inlined_call_operand.vmem [shape: f32[1,128], index: 2, kind: input, shape index: {}]   ;;  %s342_s3 = inlined_call_operand.hbm [shape: f32[16,128], index: 3, kind: output, shape index: {}]  }
   0x1   :  { %9 = vsyncpa [#allocation6], 0 }
   0x2   :  { %10 = vsyncpa [#allocation4], 0  ;;  %s15_s14 = sshll.u32 %s339_s0, 4  ;;  %s300_s15 = smov [#allocation2]   ;;  %s16_s14 = int_to_ptr.hbm [resolvable:$true] %s15_s14 }
   0x3   :  { %s17_s16 = sshll.u32 %s300_s15, 4  ;;  %s28_s19 = sshll.u32 %s340_s1, 4  ;;  %s18_s16 = int_to_ptr.vmem [resolvable:$true] %s17_s16  ;;  %s29_s19 = int_to_ptr.hbm [resolvable:$true] %s28_s19 }
   0x4   :  { %s301_s20 = smov 64   ;;  %s302_s21 = smov 4  }
   0x5   :  { %23 = dma.hbm_to_vmem [thread:$0]  %s16_s14, 128, %s18_s16, [#allocation3], %s301_s20, %s301_s20, %s302_s21  }
   0x6   :  { %s303_s22 = smov [#allocation5]  }
   0x7   :  { %s30_s23 = sshll.u32 %s303_s22, 4  ;;  %s31_s23 = int_to_ptr.vmem [resolvable:$true] %s30_s23 }
   0x8   :  { %36 = dma.hbm_to_vmem [thread:$0]  %s29_s19, 1024, %s31_s23, [#allocation6], %s301_s20, %s301_s20, %s302_s21  }
   0x9   :  { %294 = dma.done.wait [#allocation3], 128  }
   0xa   :  { %295 = vsyncadd [#allocation3], 4294967168 }
   0xb   :  { %296 = dma.done.wait [#allocation6], 1024  }
   0xc   :  { %297 = vsyncadd [#allocation6], 4294966272  ;;  %v213_v0 = vld [vmem:[#allocation5 + $0x38] sm:$0xff]  ;;  %v212_v1 = vld [vmem:[#allocation5 + $0x30] sm:$0xff]  ;;  %s304_s24 = smov [#allocation7]   ;;  %s155_s28 = sshll.u32 %s342_s3, 4  ;;  %s156_s28 = int_to_ptr.hbm [resolvable:$true] %s155_s28 }
   0xd   :  { %131 = vmatpush.bf16.msra.mxu0 %v213_v0  ;;  %v211_v2 = vld [vmem:[#allocation5 + $0x28] sm:$0xff]  ;;  %v210_v3 = vld [vmem:[#allocation5 + $0x20] sm:$0xff]  ;;  %v209_v4 = vld [vmem:[#allocation5 + $0x18] sm:$0xff]  ;;  %s153_s25 = sshll.u32 %s304_s24, 4  ;;  %s305_s29 = smov 128   ;;  %s154_s25 = int_to_ptr.vmem [resolvable:$true] %s153_s25 }
   0xe   :  { %v208_v5 = vld [vmem:[#allocation5 + $0x10] sm:$0xff]  ;;  %v207_v6 = vld [vmem:[#allocation5 + $0x8] sm:$0xff]  ;;  %v206_v7 = vld [vmem:[#allocation5] sm:$0xff]  ;;  %s306_s30 = smov 8  }
   0xf   :  { %v205_v8 = vld [vmem:[#allocation2] sm:$0xff] }
  0x10   :  { %v221_v9 = vld [vmem:[%s341_s2] ss:$0 sm:$0xff] }
  0x11   :  { %132 = vmatpush.bf16.msra.mxu0 %v212_v1 }
  0x15   :  { %133 = vmatpush.bf16.msra.mxu0 %v211_v2 }
  0x19   :  { %134 = vmatpush.bf16.msra.mxu0 %v210_v3 }
  0x1d   :  { %135 = vmatpush.bf16.msra.mxu0 %v209_v4 }
  0x21   :  { %136 = vmatpush.bf16.msra.mxu0 %v208_v5 }
  0x25   :  { %137 = vmatpush.bf16.msra.mxu0 %v207_v6 }
  0x29   :  { %138 = vmatpush.bf16.msra.mxu0 %v206_v7 }
  0x2c   :  { %139 = vmatmul.bf16.vlgmr.msra.gmra.mxu0 %v205_v8 }
  0xa9   :  { %v140_v10 = vpop.f32.mrf.mxu0 }
  0xaa   :  { %v145_v11 = vadd.f32 %v221_v9, %v140_v10 }
  0xac   :  { %147 = vst [vmem:[#allocation7] sm:$0xff] %v145_v11 }
  0xb1   :  { %v142_v12 = vpop.f32.mrf.mxu0 }
  0xb2   :  { %v146_v13 = vadd.f32 %v221_v9, %v142_v12 }
  0xb4   :  { %148 = vst [vmem:[#allocation7 + $0x8] sm:$0xff] %v146_v13 }
  0xb5   :  { %161 = dma.vmem_to_hbm [thread:$0]  %s154_s25, 256, %s156_s28, [#allocation4], %s305_s29, %s305_s29, %s306_s30  }
  0xb6   :  { %298 = dma.done.wait [#allocation4], 256  }
  0xb7   :  { %299 = vsyncadd [#allocation4], 4294967040 }
  0xb8   :  { %166 = vsyncpa [#allocation3], 1 }
  0xb9   :  { %167 = vsyncpa [#allocation6], 1 }
  0xba   :  { %168 = vsyncpa [#allocation4], 1 }

</bundles_post_ra>
